<compile_context>
chip_gen: v6e
topology: v6e:2x2x1
jax: 0.10.0
libtpu: 0.0.40
codegen_flags: <defaults>
</compile_context>

<pallas_src>
import functools

import jax
import jax.numpy as jnp
from jax.experimental import pallas as pl
from jax.experimental.pallas import tpu as pltpu


def _round_up(x: int, m: int) -> int:
    return (x + m - 1) // m * m


def _policy_kernel(x_ref, w1_ref, b1_ref, w2_ref, b2_ref, o_ref, *, action_bound):
    # fc1: (tb, S) @ (S, H) with f32 accumulation; bias + relu in f32.
    h = jnp.dot(x_ref[...], w1_ref[...], preferred_element_type=jnp.float32)
    h = jnp.maximum(h + b1_ref[...], 0.0)
    # fc2: (tb, H) @ (H, A) with f32 accumulation; bias + tanh + scale in f32.
    a = jnp.dot(h.astype(w2_ref.dtype), w2_ref[...],
                preferred_element_type=jnp.float32)
    a = a + b2_ref[...]
    o_ref[...] = (jnp.tanh(a) * jnp.float32(action_bound)).astype(o_ref.dtype)


def policy_net_forward(x, w1, b1, w2, b2, action_bound,
                       *, tile_b: int = 8192, matmul_dtype=None):
    """DDPG actor forward.

    x:  (B, state_dim)        activations (streamed per batch tile, unpadded)
    w1: (state_dim, hidden)   fc1 weight (already transposed to (in, out))
    b1: (hidden,) or (1, hidden)
    w2: (hidden, action_dim)  fc2 weight
    b2: (action_dim,) or (1, action_dim)

    matmul_dtype=None keeps x's own dtype (no extra HBM cast pass).  Pass
    jnp.bfloat16 (ideally with x already bf16) for bf16 MXU streaming; the
    accumulate and the bias/relu/tanh epilogue stay f32 (v5e-safe).
    Returns (B, action_dim) float32.
    """
    B, S = x.shape
    S_w, H = w1.shape
    H_w, A = w2.shape
    assert S == S_w and H == H_w

    mdt = x.dtype if matmul_dtype is None else jnp.dtype(matmul_dtype)
    if x.dtype != mdt:
        # Explicitly requested cast: an extra HBM pass, prefer passing x in
        # the target dtype from the caller.
        x = x.astype(mdt)
    w1 = jnp.asarray(w1, mdt)
    w2 = jnp.asarray(w2, mdt)
    b1 = jnp.asarray(b1, jnp.float32).reshape(1, H)
    b2 = jnp.asarray(b2, jnp.float32).reshape(1, A)

    # Batch tile: multiple of 8 sublanes, large to amortize per-step overhead.
    b_p = _round_up(max(B, 8), 8)
    tb = min(_round_up(tile_b, 8), b_p)
    # v7x megacore: keep >=4 grid steps when the batch is big enough that the
    # extra per-step overhead is negligible (so "parallel" shards across TCs).
    quarter = _round_up(max(pl.cdiv(b_p, 4), 8), 8)
    if quarter >= 512:
        tb = min(tb, quarter)
    grid = pl.cdiv(B, tb)  # ragged last tile is masked; no batch rounding-up.

    kernel = functools.partial(_policy_kernel, action_bound=float(action_bound))

    itemsize = jnp.dtype(mdt).itemsize
    cost = pl.CostEstimate(
        flops=2 * B * (S * H + H * A),
        transcendentals=B * A,
        bytes_accessed=(B * S * itemsize          # x in (unpadded)
                        + S * H * itemsize        # w1
                        + H * A * itemsize        # w2
                        + (H + A) * 4             # biases
                        + B * A * 4),             # out (unpadded)
    )

    return pl.pallas_call(
        kernel,
        out_shape=jax.ShapeDtypeStruct((B, A), jnp.float32),
        grid=(grid,),
        in_specs=[
            pl.BlockSpec((tb, S), lambda i: (i, 0)),   # x: streamed per tile
            pl.BlockSpec((S, H), lambda i: (0, 0)),    # w1: VMEM-resident
            pl.BlockSpec((1, H), lambda i: (0, 0)),    # b1
            pl.BlockSpec((H, A), lambda i: (0, 0)),    # w2
            pl.BlockSpec((1, A), lambda i: (0, 0)),    # b2
        ],
        out_specs=pl.BlockSpec((tb, A), lambda i: (i, 0)),
        compiler_params=pltpu.CompilerParams(
            dimension_semantics=("parallel",)),
        cost_estimate=cost,
    )(x, w1, b1, w2, b2)


def init_params(key, state_dim, hidden_dim, action_dim):
    """PyTorch-Linear-style init (uniform +/- 1/sqrt(fan_in)).

    Weights are returned already transposed to (in, out) layout.
    """
    k1, k2, k3, k4 = jax.random.split(key, 4)
    bound1 = 1.0 / jnp.sqrt(jnp.float32(state_dim))
    bound2 = 1.0 / jnp.sqrt(jnp.float32(hidden_dim))
    w1 = jax.random.uniform(k1, (state_dim, hidden_dim), jnp.float32, -bound1, bound1)
    b1 = jax.random.uniform(k2, (1, hidden_dim), jnp.float32, -bound1, bound1)
    w2 = jax.random.uniform(k3, (hidden_dim, action_dim), jnp.float32, -bound2, bound2)
    b2 = jax.random.uniform(k4, (1, action_dim), jnp.float32, -bound2, bound2)
    return w1, b1, w2, b2


def _reference(x, w1, b1, w2, b2, action_bound):
    return jnp.tanh(jnp.maximum(x @ w1 + b1, 0.0) @ w2 + b2) * action_bound


if __name__ == "__main__":
    # Small shapes consistent with the module: x is (batch, state_dim).
    batch, state_dim, hidden_dim, action_dim = 8, 16, 32, 4
    action_bound = 2.0

    key = jax.random.PRNGKey(0)
    kx, kx2, kp = jax.random.split(key, 3)
    x = jax.random.normal(kx, (batch, state_dim), jnp.float32)
    w1, b1, w2, b2 = init_params(kp, state_dim, hidden_dim, action_dim)

    ref = _reference(x, w1, b1, w2, b2, action_bound)

    # f32 path, single grid step.  Tolerance allows for MXU bf16-pass lowering
    # of f32 dots under default precision.
    out = jax.block_until_ready(policy_net_forward(x, w1, b1, w2, b2, action_bound))
    assert out.shape == (batch, action_dim)
    assert jnp.allclose(out, ref, atol=5e-3, rtol=5e-3)

    # Multi-step grid with a ragged (masked) last tile: 200 rows, 64-row tiles.
    x2 = jax.random.normal(kx2, (200, state_dim), jnp.float32)
    ref2 = _reference(x2, w1, b1, w2, b2, action_bound)
    out2 = jax.block_until_ready(
        policy_net_forward(x2, w1, b1, w2, b2, action_bound, tile_b=64))
    assert out2.shape == (200, action_dim)
    assert jnp.allclose(out2, ref2, atol=5e-3, rtol=5e-3)

    # bf16 streaming path (v5e-friendly): bf16 MXU inputs, f32 accumulate and
    # f32 bias/relu/tanh epilogue.
    out_bf16 = jax.block_until_ready(
        policy_net_forward(x, w1, b1, w2, b2, action_bound,
                           matmul_dtype=jnp.bfloat16))
    assert jnp.allclose(out_bf16, ref, atol=3e-2, rtol=3e-2)

    print("KERNEL_OK")
</pallas_src>

<mosaic_0001>
module attributes {stable_mosaic.version = 11 : i64} {
  func.func @_policy_kernel(%arg0: i32, %arg1: memref<8x16xf32, #tpu.memory_space<vmem>>, %arg2: memref<16x32xf32, #tpu.memory_space<vmem>>, %arg3: memref<1x32xf32, #tpu.memory_space<vmem>>, %arg4: memref<32x4xf32, #tpu.memory_space<vmem>>, %arg5: memref<1x4xf32, #tpu.memory_space<vmem>>, %arg6: memref<8x4xf32, #tpu.memory_space<vmem>>) attributes {dimension_semantics = [#tpu.dimension_semantics<parallel>], iteration_bounds = array<i64: 1>, scalar_prefetch = 0 : i64, scratch_operands = 0 : i64, tpu.core_type = #tpu.core_type<tc>, window_params = [{transform_indices = @transform_0, window_bounds = array<i64: 8, 16>}, {pipeline_mode = #tpu.pipeline_mode<synchronous>, transform_indices = @transform_1, window_bounds = array<i64: 16, 32>}, {pipeline_mode = #tpu.pipeline_mode<synchronous>, transform_indices = @transform_2, window_bounds = array<i64: 1, 32>}, {pipeline_mode = #tpu.pipeline_mode<synchronous>, transform_indices = @transform_3, window_bounds = array<i64: 32, 4>}, {pipeline_mode = #tpu.pipeline_mode<synchronous>, transform_indices = @transform_4, window_bounds = array<i64: 1, 4>}, {transform_indices = @transform_5, window_bounds = array<i64: 8, 4>}]} {
    %c0 = arith.constant 0 : index
    %c0_0 = arith.constant 0 : index
    %0 = vector.load %arg1[%c0, %c0_0] : memref<8x16xf32, #tpu.memory_space<vmem>>, vector<8x16xf32>
    %c0_1 = arith.constant 0 : index
    %c0_2 = arith.constant 0 : index
    %1 = vector.load %arg2[%c0_1, %c0_2] : memref<16x32xf32, #tpu.memory_space<vmem>>, vector<16x32xf32>
    %cst = arith.constant dense<0.000000e+00> : vector<8x32xf32>
    %2 = tpu.matmul %0, %1, %cst {dimension_numbers = #tpu.dot_dimension_numbers<[1], [0], [0], [1], [0, 0, 1, 1], [], []>} : vector<8x16xf32>, vector<16x32xf32>, vector<8x32xf32> -> vector<8x32xf32>
    %c0_3 = arith.constant 0 : index
    %c0_4 = arith.constant 0 : index
    %3 = vector.load %arg3[%c0_3, %c0_4] : memref<1x32xf32, #tpu.memory_space<vmem>>, vector<1x32xf32>
    %4 = vector.broadcast %3 : vector<1x32xf32> to vector<8x32xf32>
    %5 = arith.addf %2, %4 : vector<8x32xf32>
    %cst_5 = arith.constant 0.000000e+00 : f32
    %6 = vector.broadcast %cst_5 : f32 to vector<8x32xf32>
    %7 = arith.maximumf %5, %6 : vector<8x32xf32>
    %c0_6 = arith.constant 0 : index
    %c0_7 = arith.constant 0 : index
    %8 = vector.load %arg4[%c0_6, %c0_7] : memref<32x4xf32, #tpu.memory_space<vmem>>, vector<32x4xf32>
    %cst_8 = arith.constant dense<0.000000e+00> : vector<8x4xf32>
    %9 = tpu.matmul %7, %8, %cst_8 {dimension_numbers = #tpu.dot_dimension_numbers<[1], [0], [0], [1], [0, 0, 1, 1], [], []>} : vector<8x32xf32>, vector<32x4xf32>, vector<8x4xf32> -> vector<8x4xf32>
    %c0_9 = arith.constant 0 : index
    %c0_10 = arith.constant 0 : index
    %10 = vector.load %arg5[%c0_9, %c0_10] : memref<1x4xf32, #tpu.memory_space<vmem>>, vector<1x4xf32>
    %11 = vector.broadcast %10 : vector<1x4xf32> to vector<8x4xf32>
    %12 = arith.addf %9, %11 : vector<8x4xf32>
    %13 = math.tanh %12 : vector<8x4xf32>
    %cst_11 = arith.constant 2.000000e+00 : f32
    %14 = vector.broadcast %cst_11 : f32 to vector<8x4xf32>
    %15 = arith.mulf %13, %14 : vector<8x4xf32>
    %c0_12 = arith.constant 0 : index
    %c0_13 = arith.constant 0 : index
    %16 = vector.load %arg6[%c0_12, %c0_13] : memref<8x4xf32, #tpu.memory_space<vmem>>, vector<8x4xf32>
    tpu.vector_store %arg6[%c0_12, %c0_13], %15 {strides = array<i32>} : memref<8x4xf32, #tpu.memory_space<vmem>>, vector<8x4xf32>,
    return
  }
  func.func @transform_0(%arg0: i32) -> (i32, i32) {
    %c0_i32 = arith.constant 0 : i32
    %c0_i32_0 = arith.constant 0 : i32
    return %arg0, %c0_i32 : i32, i32
  }
  func.func @transform_1(%arg0: i32) -> (i32, i32) {
    %c0_i32 = arith.constant 0 : i32
    %c0_i32_0 = arith.constant 0 : i32
    %c0_i32_1 = arith.constant 0 : i32
    return %c0_i32, %c0_i32_0 : i32, i32
  }
  func.func @transform_2(%arg0: i32) -> (i32, i32) {
    %c0_i32 = arith.constant 0 : i32
    %c0_i32_0 = arith.constant 0 : i32
    %c0_i32_1 = arith.constant 0 : i32
    return %c0_i32, %c0_i32_0 : i32, i32
  }
  func.func @transform_3(%arg0: i32) -> (i32, i32) {
    %c0_i32 = arith.constant 0 : i32
    %c0_i32_0 = arith.constant 0 : i32
    %c0_i32_1 = arith.constant 0 : i32
    return %c0_i32, %c0_i32_0 : i32, i32
  }
  func.func @transform_4(%arg0: i32) -> (i32, i32) {
    %c0_i32 = arith.constant 0 : i32
    %c0_i32_0 = arith.constant 0 : i32
    %c0_i32_1 = arith.constant 0 : i32
    return %c0_i32, %c0_i32_0 : i32, i32
  }
  func.func @transform_5(%arg0: i32) -> (i32, i32) {
    %c0_i32 = arith.constant 0 : i32
    %c0_i32_0 = arith.constant 0 : i32
    return %arg0, %c0_i32 : i32, i32
  }
}

</mosaic_0001>

<bundles_post_ra>
// kernel: tpu_custom_call.1
= control target key start
LH: loop header
LB: loop body
LE: loop exit
PB: predicated region body
PF: predicated region fallthrough
CT: control target
= control target key end

     0   :  { %v232_v0 = vmov 0.0   ;;  %vm233_vm0 = vmmov 0   ;;  %vm30_vm1 = vcmask 130048   ;;  %vm116_vm2 = vcmask 261120   ;;  %s294_s1 = inlined_call_operand.vmem [shape: f32[16,32], index: 1, kind: input, shape index: {}]   ;;  %s295_s0 = inlined_call_operand.vmem [shape: f32[8,16], index: 0, kind: input, shape index: {}]   ;;  %s296_s3 = inlined_call_operand.vmem [shape: f32[32,4], index: 3, kind: input, shape index: {}]   ;;  %s297_s2 = inlined_call_operand.vmem [shape: f32[1,32], index: 2, kind: input, shape index: {}]   ;;  %s298_s4 = inlined_call_operand.vmem [shape: f32[1,4], index: 4, kind: input, shape index: {}]   ;;  %s299_s5 = inlined_call_operand.vmem [shape: f32[8,4], index: 5, kind: output, shape index: {}]  }
   0x1   :  { %210 = vmatprep.subr.mxu0 %v232_v0  ;;  %v22_v1 = vld [vmem:[%s294_s1 + $0x8] sm:$0xff]  ;;  %v21_v2 = vld [vmem:[%s294_s1] sm:$0xff]  ;;  %214 = vmatprep.mubr.msk.f32.mxu0 %vm233_vm0, %v232_v0  ;;  %v108_v4 = vld [vmem:[%s296_s3 + $0x18] sm:$0xff]  ;;  %vm192_vm3 = vcmask 31744  }
   0x2   :  { %211 = vmatpush3.msra.mxu0 %v22_v1  ;;  %v20_v3 = vld [vmem:[%s295_s0] sm:$0xff]  ;;  %217 = vmatprep.subr.mxu1 %v232_v0  ;;  %v107_v5 = vld [vmem:[%s296_s3 + $0x10] sm:$0xff]  ;;  %v106_v6 = vld [vmem:[%s296_s3 + $0x8] sm:$0xff] }
   0x3   :  { %212 = vmatprep.subr.mxu0 %v232_v0  ;;  %218 = vmatpush3.msra.mxu1 %v108_v4  ;;  %v105_v7 = vld [vmem:[%s296_s3] sm:$0xff] }
   0x4   :  { %213 = vmatpush3.msra.mxu0 %v21_v2  ;;  %219 = vmatprep.subr.mxu1 %v232_v0  ;;  %v198_v8 = vld [vmem:[%s297_s2] ss:$0 sm:$0xff] }
   0x5   :  { %215 = vmatmul.mubr.msk.f32.vlgmr.msra.gmra.mxu0 %vm30_vm1, %v20_v3  ;;  %225 = vmatprep.mubr.msk.f32.mxu1 %vm233_vm0, %v232_v0  ;;  %v200_v13 = vld [vmem:[%s298_s4] ss:$0 sm:$0xff] }
   0x6   :  { %220 = vmatpush3.msra.mxu1 %v107_v5 }
   0x7   :  { %221 = vmatprep.subr.mxu1 %v232_v0 }
   0x8   :  { %222 = vmatpush3.msra.mxu1 %v106_v6 }
   0x9   :  { %223 = vmatprep.subr.mxu1 %v232_v0 }
   0xa   :  { %224 = vmatpush3.msra.mxu1 %v105_v7 }
  0xc5   :  { %v100_v9 = vpop.f32.mrf.mxu0 }
  0xc6   :  { %v101_v10 = vadd.f32 %v198_v8, %v100_v9 }
  0xc7   :  { %v216_v11 = vpop.f32.mrf.mxu0 }
  0xc8   :  { %v104_v12 = vmax.f32 %v101_v10, 0.0 }
  0xca   :  { %226 = vmatmul.mubr.msk.f32.vlgmr.msra.gmra.mxu1 %vm116_vm2, %v104_v12 }
 0x18a   :  { %v186_v14 = vpop.f32.mrf.mxu1 }
 0x18b   :  { %v187_v15 = vadd.f32 %v200_v13, %v186_v14 }
 0x18c   :  { %v227_v16 = vpop.f32.mrf.mxu1 }
 0x18d   :  { %230 = vtanh.f32 %v187_v15 }
 0x19a   :  { %v231_v17 = vpop.eup %230 }
 0x19b   :  { %v191_v18 = vmul.f32 2.0, %v231_v17 }
 0x19d   :  { %193 = vst.msk [vmem:[%s299_s5] sm:$0xff] %vm192_vm3, %v191_v18 }

</bundles_post_ra>
